<compile_context>
chip_gen: v7x
topology: tpu7x:2x2x1
jax: 0.10.0
libtpu: 0.0.40
codegen_flags: <defaults>
</compile_context>

<pallas_src>
import jax
import jax.numpy as jnp
from jax.experimental import pallas as pl
from jax.experimental.pallas import tpu as pltpu


_MIN_TILE = 16                       # row-tile quantum (= rows per image in layer 3)
_PIPELINE_VMEM_BUDGET = 12 << 20     # bytes for double-buffered in/out blocks (all gens)


def _round_up(x, m):
    return (x + m - 1) // m * m


def _pick_tm(M, row_bytes):
    """Rows per grid block: large enough to amortize per-step overhead, small enough to
    (a) stay inside a conservative VMEM pipeline budget and (b) give >=2 (target 4) grid
    blocks so v7x's two TensorCores both get work on the 'parallel' M axis."""
    by_vmem = max(_MIN_TILE,
                  (_PIPELINE_VMEM_BUDGET // max(row_bytes, 1)) // _MIN_TILE * _MIN_TILE)
    by_split = _round_up(-(-M // 4), _MIN_TILE)   # target >=4 blocks (>=2 at tiny M)
    return max(_MIN_TILE, min(by_vmem, by_split, 4096))


def _vmem_limit_bytes(tm, K, Cout, out_cols, out_bytes, extra_bytes=0):
    """Explicit scoped-VMEM limit derived from the actual double-buffered block bytes
    (plus margin); stays within every generation's physical VMEM (v7x: 64 MiB/TC)."""
    need = (2 * tm * K * 2          # activation blocks (bf16, double buffered)
            + 2 * K * Cout * 2      # weight (bf16; conservatively counted twice)
            + 2 * Cout * 4          # bias (f32)
            + 2 * tm * out_cols * out_bytes
            + extra_bytes)
    return int(min(max(need + (16 << 20), 32 << 20), 48 << 20))


# ------------------------------- Pallas kernels -------------------------------
def _conv_mm_lrelu_kernel(x_ref, w_ref, b_ref, o_ref):
    # MXU matmul (bf16 in, f32 accumulate) + folded-BN bias + LeakyReLU(0.2);
    # Cout is always a multiple of 128 here, so the bf16 store is lane-dense.
    y = jnp.dot(x_ref[...], w_ref[...], preferred_element_type=jnp.float32)
    y = y + b_ref[...]
    y = jnp.where(y > 0, y, 0.2 * y)                  # VPU select
    o_ref[...] = y.astype(o_ref.dtype)


def _conv_mm_lrelu_head_kernel(x_ref, w_ref, b_ref, w4_ref, o_ref):
    # Layer 3 + fused final Conv(4f->1, 4, 1, 0) head.  After the BN+LeakyReLU matmul,
    # multiply by the per-spatial-tap final-conv weight row (row r <-> tap r % 16) and
    # lane-reduce (XLU), emitting one f32 partial per row.  The per-image sum of the 16
    # partials + exact sigmoid happen in a tiny XLA epilogue, so the 4x4x4f activation
    # never hits HBM and no separate GEMV pallas_call is needed.
    y = jnp.dot(x_ref[...], w_ref[...], preferred_element_type=jnp.float32)
    y = y + b_ref[...]
    y = jnp.where(y > 0, y, 0.2 * y)
    o_ref[...] = jnp.sum(y * w4_ref[...].astype(jnp.float32), axis=-1, keepdims=True)


# --------------------------------- wrappers -----------------------------------
def fused_conv_matmul(patches, w, bias, *, out_dtype=jnp.bfloat16):
    """patches: [M, K] bf16 im2col rows; w: [K, Cout] bf16 (BN scale folded in);
    bias: [Cout] f32.  Returns LeakyReLU(patches @ w + bias) as [M, Cout] out_dtype."""
    M, K = patches.shape
    Kw, Cout = w.shape
    assert K == Kw
    out_bytes = jnp.dtype(out_dtype).itemsize
    tm = _pick_tm(M, 2 * K * 2 + 2 * Cout * out_bytes)
    grid = (pl.cdiv(M, tm),)   # no input padding: Pallas masks the partial last block
    return pl.pallas_call(
        _conv_mm_lrelu_kernel,
        out_shape=jax.ShapeDtypeStruct((M, Cout), out_dtype),
        grid=grid,
        in_specs=[
            pl.BlockSpec((tm, K), lambda i: (i, 0)),     # activations: tiled over M
            pl.BlockSpec((K, Cout), lambda i: (0, 0)),   # weight: VMEM-resident
            pl.BlockSpec((1, Cout), lambda i: (0, 0)),   # folded-BN bias
        ],
        out_specs=pl.BlockSpec((tm, Cout), lambda i: (i, 0)),
        compiler_params=pltpu.CompilerParams(
            dimension_semantics=("parallel",),
            vmem_limit_bytes=_vmem_limit_bytes(tm, K, Cout, Cout, out_bytes),
        ),
    )(patches, w, bias.reshape(1, Cout).astype(jnp.float32))


def fused_conv_matmul_head(patches, w, bias, w4_rows):
    """Layer-3 GEMM + BN + LeakyReLU with the final Conv(4f->1, 4, 1, 0) head fused in.
    patches: [M, K] bf16 with 16 consecutive rows per image (the 4x4 spatial taps);
    w4_rows: [16, Cout] bf16 final-conv weight, one row per spatial tap.
    Returns [M, 1] f32 per-row partial logits."""
    M, K = patches.shape
    Kw, Cout = w.shape
    assert K == Kw and M % 16 == 0 and w4_rows.shape == (16, Cout)
    tm = _pick_tm(M, 2 * K * 2 + 2 * Cout * 2 + 2 * 4)   # multiple of 16: whole images/block
    w4_tiled = jnp.tile(w4_rows, (tm // 16, 1))          # block row r <-> spatial tap r % 16
    grid = (pl.cdiv(M, tm),)
    return pl.pallas_call(
        _conv_mm_lrelu_head_kernel,
        out_shape=jax.ShapeDtypeStruct((M, 1), jnp.float32),
        grid=grid,
        in_specs=[
            pl.BlockSpec((tm, K), lambda i: (i, 0)),
            pl.BlockSpec((K, Cout), lambda i: (0, 0)),
            pl.BlockSpec((1, Cout), lambda i: (0, 0)),
            pl.BlockSpec((tm, Cout), lambda i: (0, 0)),  # tiled final-conv weight rows
        ],
        out_specs=pl.BlockSpec((tm, 1), lambda i: (i, 0)),
        compiler_params=pltpu.CompilerParams(
            dimension_semantics=("parallel",),
            vmem_limit_bytes=_vmem_limit_bytes(tm, K, Cout, 1, 4,
                                               extra_bytes=2 * tm * Cout * 2),
        ),
    )(patches, w, bias.reshape(1, Cout).astype(jnp.float32), w4_tiled)


# ------------------------------ im2col (in XLA) --------------------------------
def extract_patches(x_nhwc, kh, kw, stride, pad):
    """im2col with feature order (KH, KW, Cin): no transpose of the (batch-scaled)
    patch tensor; the matching flatten is applied to the tiny weight instead."""
    x = jnp.pad(x_nhwc, ((0, 0), (pad, pad), (pad, pad), (0, 0)))
    N, H, W, C = x.shape
    oh = (H - kh) // stride + 1
    ow = (W - kw) // stride + 1
    cols = []
    for i in range(kh):
        for j in range(kw):
            cols.append(x[:, i:i + stride * oh:stride, j:j + stride * ow:stride, :])
    p = jnp.stack(cols, axis=3)                       # [N, OH, OW, KH*KW, C]
    return p.reshape(N * oh * ow, kh * kw * C), oh, ow


def _flatten_weight(w_oihw, scale=None):
    """[Cout, Cin, KH, KW] -> [KH*KW*Cin, Cout] (matches the patch feature order), with
    the eval-mode BatchNorm scale folded in (f32) before the bf16 cast in the caller."""
    cout, cin, kh, kw = w_oihw.shape
    w2d = w_oihw.transpose(2, 3, 1, 0).reshape(kh * kw * cin, cout).astype(jnp.float32)
    if scale is not None:
        w2d = w2d * scale.astype(jnp.float32)[None, :]
    return w2d


def conv_block(x_nhwc, w_oihw, stride, pad, scale, bias, *, pack=1):
    """Conv2d(bias=False) + folded-BN affine + LeakyReLU(0.2) as one Pallas GEMM.

    pack > 1 groups `pack` consecutive output pixels into one GEMM row (block-diagonal
    weight via jnp.kron) so both the K axis and the stored Cout axis are 128-lane dense
    for the narrow early layers.  The packing is only order-preserving reshapes."""
    n = x_nhwc.shape[0]
    cout, cin, kh, kw = w_oihw.shape
    patches, oh, ow = extract_patches(x_nhwc, kh, kw, stride, pad)
    w2d = _flatten_weight(w_oihw, scale)
    b = bias.astype(jnp.float32)
    m, k = patches.shape
    if pack > 1:
        assert m % pack == 0
        patches = patches.reshape(m // pack, pack * k)          # row-major: free
        w2d = jnp.kron(jnp.eye(pack, dtype=jnp.float32), w2d)   # block-diagonal weight
        b = jnp.tile(b, pack)
    y = fused_conv_matmul(patches.astype(jnp.bfloat16), w2d.astype(jnp.bfloat16), b)
    return y.reshape(n, oh, ow, cout)                           # row-major: free


# --------------------------------- model ---------------------------------------
def init_params(key, features=32, num_channels=1):
    # Deterministic synthetic init (DCGAN-style N(0, 0.02) conv weights, bias=False).
    f = features
    ks = jax.random.split(key, 8)
    p = {}
    p["w1"] = 0.02 * jax.random.normal(ks[0], (f, num_channels, 4, 4), jnp.float32)
    p["w2"] = 0.02 * jax.random.normal(ks[1], (2 * f, f, 4, 4), jnp.float32)
    p["w3"] = 0.02 * jax.random.normal(ks[2], (4 * f, 2 * f, 4, 4), jnp.float32)
    p["w4"] = 0.02 * jax.random.normal(ks[3], (1, 4 * f, 4, 4), jnp.float32)
    p["bn2_gamma"] = 1.0 + 0.02 * jax.random.normal(ks[4], (2 * f,), jnp.float32)
    p["bn2_beta"] = 0.02 * jax.random.normal(ks[5], (2 * f,), jnp.float32)
    p["bn2_mean"] = jnp.zeros((2 * f,), jnp.float32)
    p["bn2_var"] = jnp.ones((2 * f,), jnp.float32)
    p["bn3_gamma"] = 1.0 + 0.02 * jax.random.normal(ks[6], (4 * f,), jnp.float32)
    p["bn3_beta"] = 0.02 * jax.random.normal(ks[7], (4 * f,), jnp.float32)
    p["bn3_mean"] = jnp.zeros((4 * f,), jnp.float32)
    p["bn3_var"] = jnp.ones((4 * f,), jnp.float32)
    return p


def discriminator_forward(params, x_nchw, features=32):
    """features=32 path of Discriminator (all convs bias=False), 32x32 input:
         Conv(C->f,4,2,1) LReLU -> Conv(f->2f,4,2,1) BN LReLU
         -> Conv(2f->4f,4,2,1) BN LReLU -> Conv(4f->1,4,1,0) Sigmoid.
    BatchNorm is applied in eval (inference) mode, folded to a per-channel affine."""
    eps = 1e-5
    f = features
    n = x_nchw.shape[0]
    # NCHW -> NHWC (channels on the 128-lane axis), activations in bf16.
    x = jnp.transpose(x_nchw, (0, 2, 3, 1)).astype(jnp.bfloat16)

    # Layer 1: Conv(C->f,4,2,1) + LeakyReLU.  Pack 8 output pixels per GEMM row so both
    # K (16->128) and the stored output (32->256 lanes) are lane-dense.
    x = conv_block(x, params["w1"], 2, 1, None, jnp.zeros((f,), jnp.float32), pack=8)

    # Layer 2: Conv(f->2f,4,2,1) + BN + LeakyReLU, packed by 2 -> 128-lane-dense stores.
    s2 = params["bn2_gamma"] / jnp.sqrt(params["bn2_var"] + eps)
    b2 = params["bn2_beta"] - params["bn2_mean"] * s2
    x = conv_block(x, params["w2"], 2, 1, s2, b2, pack=2)

    # Layer 3 + fused head: Conv(2f->4f,4,2,1) + BN + LeakyReLU + Conv(4f->1,4,1,0).
    s3 = params["bn3_gamma"] / jnp.sqrt(params["bn3_var"] + eps)
    b3 = params["bn3_beta"] - params["bn3_mean"] * s3
    patches3, oh3, ow3 = extract_patches(x, 4, 4, 2, 1)
    # The fused head assumes the final 4x4 valid conv covers the whole layer-3 map
    # (i.e. canonical 32x32 input -> 4x4 map -> 1x1 output), as in the DCGAN setup.
    assert oh3 == 4 and ow3 == 4, (oh3, ow3)
    w3 = _flatten_weight(params["w3"], s3).astype(jnp.bfloat16)
    w4_rows = (params["w4"].reshape(4 * f, 4, 4).transpose(1, 2, 0)
               .reshape(16, 4 * f).astype(jnp.bfloat16))
    partial = fused_conv_matmul_head(patches3.astype(jnp.bfloat16), w3, b3, w4_rows)

    # Tiny XLA epilogue on [N, 16]: sum per-image partials, exact sigmoid.
    logits = jnp.sum(partial.reshape(n, 16), axis=-1)
    return jax.nn.sigmoid(logits).reshape(n, 1, 1, 1)   # NCHW: [N, 1, 1, 1]


if __name__ == "__main__":
    key = jax.random.PRNGKey(0)
    pkey, xkey = jax.random.split(key)
    params = init_params(pkey, features=32, num_channels=1)
    # Input consistent with the 32->16->8->4->1 spatial pyramid: [N=2, C=1, H=32, W=32]
    x = jax.random.normal(xkey, (2, 1, 32, 32), jnp.float32)

    fwd = jax.jit(discriminator_forward)
    out = fwd(params, x)
    jax.block_until_ready(out)

    assert out.shape == (2, 1, 1, 1), out.shape
    assert bool(jnp.all((out >= 0.0) & (out <= 1.0)))
    print("KERNEL_OK")
</pallas_src>

<mosaic_0001>
module attributes {stable_mosaic.version = 11 : i64} {
  func.func @_conv_mm_lrelu_kernel(%arg0: i32, %arg1: memref<16x128xbf16, #tpu.memory_space<vmem>>, %arg2: memref<128x256xbf16, #tpu.memory_space<vmem>>, %arg3: memref<1x256xf32, #tpu.memory_space<vmem>>, %arg4: memref<16x256xbf16, #tpu.memory_space<vmem>>) attributes {dimension_semantics = [#tpu.dimension_semantics<parallel>], iteration_bounds = array<i64: 4>, scalar_prefetch = 0 : i64, scratch_operands = 0 : i64, tpu.core_type = #tpu.core_type<tc>, window_params = [{transform_indices = @transform_0, window_bounds = array<i64: 16, 128>}, {pipeline_mode = #tpu.pipeline_mode<synchronous>, transform_indices = @transform_1, window_bounds = array<i64: 128, 256>}, {pipeline_mode = #tpu.pipeline_mode<synchronous>, transform_indices = @transform_2, window_bounds = array<i64: 1, 256>}, {transform_indices = @transform_3, window_bounds = array<i64: 16, 256>}]} {
    %c0 = arith.constant 0 : index
    %c0_0 = arith.constant 0 : index
    %0 = vector.load %arg1[%c0, %c0_0] : memref<16x128xbf16, #tpu.memory_space<vmem>>, vector<16x128xbf16>
    %c0_1 = arith.constant 0 : index
    %c0_2 = arith.constant 0 : index
    %1 = vector.load %arg2[%c0_1, %c0_2] : memref<128x256xbf16, #tpu.memory_space<vmem>>, vector<128x256xbf16>
    %cst = arith.constant dense<0.000000e+00> : vector<16x256xf32>
    %2 = tpu.matmul %0, %1, %cst {dimension_numbers = #tpu.dot_dimension_numbers<[1], [0], [0], [1], [0, 0, 1, 1], [], []>} : vector<16x128xbf16>, vector<128x256xbf16>, vector<16x256xf32> -> vector<16x256xf32>
    %c0_3 = arith.constant 0 : index
    %c0_4 = arith.constant 0 : index
    %3 = vector.load %arg3[%c0_3, %c0_4] : memref<1x256xf32, #tpu.memory_space<vmem>>, vector<1x256xf32>
    %4 = vector.broadcast %3 : vector<1x256xf32> to vector<16x256xf32>
    %5 = arith.addf %2, %4 : vector<16x256xf32>
    %cst_5 = arith.constant 0.000000e+00 : f32
    %6 = vector.broadcast %cst_5 : f32 to vector<16x256xf32>
    %7 = arith.cmpf ogt, %5, %6 : vector<16x256xf32>
    %cst_6 = arith.constant 2.000000e-01 : f32
    %8 = vector.broadcast %cst_6 : f32 to vector<16x256xf32>
    %9 = arith.mulf %8, %5 : vector<16x256xf32>
    %10 = arith.select %7, %5, %9 : vector<16x256xi1>, vector<16x256xf32>
    %11 = arith.truncf %10 : vector<16x256xf32> to vector<16x256xbf16>
    %c0_7 = arith.constant 0 : index
    %c0_8 = arith.constant 0 : index
    %12 = vector.load %arg4[%c0_7, %c0_8] : memref<16x256xbf16, #tpu.memory_space<vmem>>, vector<16x256xbf16>
    tpu.vector_store %arg4[%c0_7, %c0_8], %11 {strides = array<i32>} : memref<16x256xbf16, #tpu.memory_space<vmem>>, vector<16x256xbf16>,
    return
  }
  func.func @transform_0(%arg0: i32) -> (i32, i32) {
    %c0_i32 = arith.constant 0 : i32
    %c0_i32_0 = arith.constant 0 : i32
    return %arg0, %c0_i32 : i32, i32
  }
  func.func @transform_1(%arg0: i32) -> (i32, i32) {
    %c0_i32 = arith.constant 0 : i32
    %c0_i32_0 = arith.constant 0 : i32
    %c0_i32_1 = arith.constant 0 : i32
    return %c0_i32, %c0_i32_0 : i32, i32
  }
  func.func @transform_2(%arg0: i32) -> (i32, i32) {
    %c0_i32 = arith.constant 0 : i32
    %c0_i32_0 = arith.constant 0 : i32
    %c0_i32_1 = arith.constant 0 : i32
    return %c0_i32, %c0_i32_0 : i32, i32
  }
  func.func @transform_3(%arg0: i32) -> (i32, i32) {
    %c0_i32 = arith.constant 0 : i32
    %c0_i32_0 = arith.constant 0 : i32
    return %arg0, %c0_i32 : i32, i32
  }
}

module attributes {stable_mosaic.version = 11 : i64} {
  func.func @_conv_mm_lrelu_kernel(%arg0: i32, %arg1: memref<16x1024xbf16, #tpu.memory_space<vmem>>, %arg2: memref<1024x128xbf16, #tpu.memory_space<vmem>>, %arg3: memref<1x128xf32, #tpu.memory_space<vmem>>, %arg4: memref<16x128xbf16, #tpu.memory_space<vmem>>) attributes {dimension_semantics = [#tpu.dimension_semantics<parallel>], iteration_bounds = array<i64: 4>, scalar_prefetch = 0 : i64, scratch_operands = 0 : i64, tpu.core_type = #tpu.core_type<tc>, window_params = [{transform_indices = @transform_0, window_bounds = array<i64: 16, 1024>}, {pipeline_mode = #tpu.pipeline_mode<synchronous>, transform_indices = @transform_1, window_bounds = array<i64: 1024, 128>}, {pipeline_mode = #tpu.pipeline_mode<synchronous>, transform_indices = @transform_2, window_bounds = array<i64: 1, 128>}, {transform_indices = @transform_3, window_bounds = array<i64: 16, 128>}]} {
    %c0 = arith.constant 0 : index
    %c0_0 = arith.constant 0 : index
    %0 = vector.load %arg1[%c0, %c0_0] : memref<16x1024xbf16, #tpu.memory_space<vmem>>, vector<16x1024xbf16>
    %c0_1 = arith.constant 0 : index
    %c0_2 = arith.constant 0 : index
    %1 = vector.load %arg2[%c0_1, %c0_2] : memref<1024x128xbf16, #tpu.memory_space<vmem>>, vector<1024x128xbf16>
    %cst = arith.constant dense<0.000000e+00> : vector<16x128xf32>
    %2 = tpu.matmul %0, %1, %cst {dimension_numbers = #tpu.dot_dimension_numbers<[1], [0], [0], [1], [0, 0, 1, 1], [], []>} : vector<16x1024xbf16>, vector<1024x128xbf16>, vector<16x128xf32> -> vector<16x128xf32>
    %c0_3 = arith.constant 0 : index
    %c0_4 = arith.constant 0 : index
    %3 = vector.load %arg3[%c0_3, %c0_4] : memref<1x128xf32, #tpu.memory_space<vmem>>, vector<1x128xf32>
    %4 = vector.broadcast %3 : vector<1x128xf32> to vector<16x128xf32>
    %5 = arith.addf %2, %4 : vector<16x128xf32>
    %cst_5 = arith.constant 0.000000e+00 : f32
    %6 = vector.broadcast %cst_5 : f32 to vector<16x128xf32>
    %7 = arith.cmpf ogt, %5, %6 : vector<16x128xf32>
    %cst_6 = arith.constant 2.000000e-01 : f32
    %8 = vector.broadcast %cst_6 : f32 to vector<16x128xf32>
    %9 = arith.mulf %8, %5 : vector<16x128xf32>
    %10 = arith.select %7, %5, %9 : vector<16x128xi1>, vector<16x128xf32>
    %11 = arith.truncf %10 : vector<16x128xf32> to vector<16x128xbf16>
    %c0_7 = arith.constant 0 : index
    %c0_8 = arith.constant 0 : index
    %12 = vector.load %arg4[%c0_7, %c0_8] : memref<16x128xbf16, #tpu.memory_space<vmem>>, vector<16x128xbf16>
    tpu.vector_store %arg4[%c0_7, %c0_8], %11 {strides = array<i32>} : memref<16x128xbf16, #tpu.memory_space<vmem>>, vector<16x128xbf16>,
    return
  }
  func.func @transform_0(%arg0: i32) -> (i32, i32) {
    %c0_i32 = arith.constant 0 : i32
    %c0_i32_0 = arith.constant 0 : i32
    return %arg0, %c0_i32 : i32, i32
  }
  func.func @transform_1(%arg0: i32) -> (i32, i32) {
    %c0_i32 = arith.constant 0 : i32
    %c0_i32_0 = arith.constant 0 : i32
    %c0_i32_1 = arith.constant 0 : i32
    return %c0_i32, %c0_i32_0 : i32, i32
  }
  func.func @transform_2(%arg0: i32) -> (i32, i32) {
    %c0_i32 = arith.constant 0 : i32
    %c0_i32_0 = arith.constant 0 : i32
    %c0_i32_1 = arith.constant 0 : i32
    return %c0_i32, %c0_i32_0 : i32, i32
  }
  func.func @transform_3(%arg0: i32) -> (i32, i32) {
    %c0_i32 = arith.constant 0 : i32
    %c0_i32_0 = arith.constant 0 : i32
    return %arg0, %c0_i32 : i32, i32
  }
}

module attributes {stable_mosaic.version = 11 : i64} {
  func.func @_conv_mm_lrelu_head_kernel(%arg0: i32, %arg1: memref<16x1024xbf16, #tpu.memory_space<vmem>>, %arg2: memref<1024x128xbf16, #tpu.memory_space<vmem>>, %arg3: memref<1x128xf32, #tpu.memory_space<vmem>>, %arg4: memref<16x128xbf16, #tpu.memory_space<vmem>>, %arg5: memref<16x1xf32, #tpu.memory_space<vmem>>) attributes {dimension_semantics = [#tpu.dimension_semantics<parallel>], iteration_bounds = array<i64: 2>, scalar_prefetch = 0 : i64, scratch_operands = 0 : i64, tpu.core_type = #tpu.core_type<tc>, window_params = [{transform_indices = @transform_0, window_bounds = array<i64: 16, 1024>}, {pipeline_mode = #tpu.pipeline_mode<synchronous>, transform_indices = @transform_1, window_bounds = array<i64: 1024, 128>}, {pipeline_mode = #tpu.pipeline_mode<synchronous>, transform_indices = @transform_2, window_bounds = array<i64: 1, 128>}, {pipeline_mode = #tpu.pipeline_mode<synchronous>, transform_indices = @transform_3, window_bounds = array<i64: 16, 128>}, {transform_indices = @transform_4, window_bounds = array<i64: 16, 1>}]} {
    %c0 = arith.constant 0 : index
    %c0_0 = arith.constant 0 : index
    %0 = vector.load %arg1[%c0, %c0_0] : memref<16x1024xbf16, #tpu.memory_space<vmem>>, vector<16x1024xbf16>
    %c0_1 = arith.constant 0 : index
    %c0_2 = arith.constant 0 : index
    %1 = vector.load %arg2[%c0_1, %c0_2] : memref<1024x128xbf16, #tpu.memory_space<vmem>>, vector<1024x128xbf16>
    %cst = arith.constant dense<0.000000e+00> : vector<16x128xf32>
    %2 = tpu.matmul %0, %1, %cst {dimension_numbers = #tpu.dot_dimension_numbers<[1], [0], [0], [1], [0, 0, 1, 1], [], []>} : vector<16x1024xbf16>, vector<1024x128xbf16>, vector<16x128xf32> -> vector<16x128xf32>
    %c0_3 = arith.constant 0 : index
    %c0_4 = arith.constant 0 : index
    %3 = vector.load %arg3[%c0_3, %c0_4] : memref<1x128xf32, #tpu.memory_space<vmem>>, vector<1x128xf32>
    %4 = vector.broadcast %3 : vector<1x128xf32> to vector<16x128xf32>
    %5 = arith.addf %2, %4 : vector<16x128xf32>
    %cst_5 = arith.constant 0.000000e+00 : f32
    %6 = vector.broadcast %cst_5 : f32 to vector<16x128xf32>
    %7 = arith.cmpf ogt, %5, %6 : vector<16x128xf32>
    %cst_6 = arith.constant 2.000000e-01 : f32
    %8 = vector.broadcast %cst_6 : f32 to vector<16x128xf32>
    %9 = arith.mulf %8, %5 : vector<16x128xf32>
    %10 = arith.select %7, %5, %9 : vector<16x128xi1>, vector<16x128xf32>
    %c0_7 = arith.constant 0 : index
    %c0_8 = arith.constant 0 : index
    %11 = vector.load %arg4[%c0_7, %c0_8] : memref<16x128xbf16, #tpu.memory_space<vmem>>, vector<16x128xbf16>
    %12 = arith.extf %11 : vector<16x128xbf16> to vector<16x128xf32>
    %13 = arith.mulf %10, %12 : vector<16x128xf32>
    %cst_9 = arith.constant dense<0.000000e+00> : vector<16xf32>
    %14 = vector.multi_reduction <add>, %13, %cst_9 [1] : vector<16x128xf32> to vector<16xf32>
    %15 = vector.shape_cast %14 : vector<16xf32> to vector<16x1xf32>
    %c0_10 = arith.constant 0 : index
    %c0_11 = arith.constant 0 : index
    %16 = vector.load %arg5[%c0_10, %c0_11] : memref<16x1xf32, #tpu.memory_space<vmem>>, vector<16x1xf32>
    tpu.vector_store %arg5[%c0_10, %c0_11], %15 {strides = array<i32>} : memref<16x1xf32, #tpu.memory_space<vmem>>, vector<16x1xf32>,
    return
  }
  func.func @transform_0(%arg0: i32) -> (i32, i32) {
    %c0_i32 = arith.constant 0 : i32
    %c0_i32_0 = arith.constant 0 : i32
    return %arg0, %c0_i32 : i32, i32
  }
  func.func @transform_1(%arg0: i32) -> (i32, i32) {
    %c0_i32 = arith.constant 0 : i32
    %c0_i32_0 = arith.constant 0 : i32
    %c0_i32_1 = arith.constant 0 : i32
    return %c0_i32, %c0_i32_0 : i32, i32
  }
  func.func @transform_2(%arg0: i32) -> (i32, i32) {
    %c0_i32 = arith.constant 0 : i32
    %c0_i32_0 = arith.constant 0 : i32
    %c0_i32_1 = arith.constant 0 : i32
    return %c0_i32, %c0_i32_0 : i32, i32
  }
  func.func @transform_3(%arg0: i32) -> (i32, i32) {
    %c0_i32 = arith.constant 0 : i32
    %c0_i32_0 = arith.constant 0 : i32
    %c0_i32_1 = arith.constant 0 : i32
    return %c0_i32, %c0_i32_0 : i32, i32
  }
  func.func @transform_4(%arg0: i32) -> (i32, i32) {
    %c0_i32 = arith.constant 0 : i32
    %c0_i32_0 = arith.constant 0 : i32
    return %arg0, %c0_i32 : i32, i32
  }
}

</mosaic_0001>

<bundles_post_ra>
// kernel: tile.6
= control target key start
LH: loop header
LB: loop body
LE: loop exit
PB: predicated region body
PF: predicated region fallthrough
CT: control target
= control target key end

     0   :  { %s26_s0 = inlined_call_operand.<no memory space> [shape: f32[], index: 0, kind: input, shape index: {}]   ;;  %s27_s1 = inlined_call_operand.vmem [shape: f32[1,256], index: 1, kind: output, shape index: {}]  }
   0x1   :  { %v2_v0 = vstv %s26_s0 }
   0x2   :  { %3 = vst [vmem:[%s27_s1] sm:$0x1] %v2_v0  ;;  %6 = vst [vmem:[%s27_s1 + $0x1] sm:$0x1] %v2_v0 }

// kernel: discriminator_forward.3
= control target key start
LH: loop header
LB: loop body
LE: loop exit
PB: predicated region body
PF: predicated region fallthrough
CT: control target
= control target key end

     0   :  { %s517_s12 = smov 0   ;;  %s589_s0 = inlined_call_operand.vmem [shape: bf16[64,128], index: 0, kind: input, shape index: {}]   ;;  %s590_s1 = inlined_call_operand.vmem [shape: bf16[128,256], index: 1, kind: input, shape index: {}]   ;;  %s591_s2 = inlined_call_operand.vmem [shape: f32[1,256], index: 2, kind: input, shape index: {}]   ;;  %s592_s3 = inlined_call_operand.vmem [shape: bf16[64,256], index: 3, kind: output, shape index: {}]  }
   0x1 LB: > { %s420_s13 = sadd.s32 4294967295, %s494_s12   ;;  %p424_p0 = scmp.ge.s32.totalorder %s494_s12, 1  ;;  %s494_s12 = sphi %s517_s12, %s13_s12  }
   0x2   : > { %p138_p1 = scmp.lt.s32.totalorder %s494_s12, 5 }
   0x4   : > { %p139_p2 = pnand %p424_p0, %p138_p1 }
   0x5   : > { %v463_v0 = vld [vmem:[%s590_s1 + $0x4] ss:$8 sps:$4 sm:$0xff] (!%p139_p2)   ;;  %s425_s16 = sshll.u32 (!%p139_p2), %s420_s13, 1  ;;  %v465_v1 = vld [vmem:[%s590_s1] ss:$8 sps:$4 sm:$0xff] (!%p139_p2)   ;;  %v496_v2 = vmov (!%p139_p2), 0   ;;  %v197_v18 = vlaneseq (!%p139_p2) }
   0x6   : > { %142 = sbr.rel (%p139_p2) target bundleno = 261 (0x105), region = 32  ;;  %325 = vmatprep.mubr.bf16.mxu0 (!%p139_p2), %v496_v2  ;;  %p164_p3 = scmp.lt.s32.totalorder (!%p139_p2), %s425_s16, 7  ;;  %293 = vmatprep.subr.bf16.mxu0 (!%p139_p2), %v463_v0  ;;  %v466_v3 = vld [vmem:[%s590_s1 + $0x14] ss:$8 sps:$4 sm:$0xff] (!%p139_p2)   ;;  %v468_v4 = vld [vmem:[%s590_s1 + $0x10] ss:$8 sps:$4 sm:$0xff] (!%p139_p2)  }
   0x7   : > { %294 = vmatpush1.bf16.msra.mxu0 (!%p139_p2), %v465_v1  ;;  %v469_v5 = vld [vmem:[%s590_s1 + $0x24] ss:$8 sps:$4 sm:$0xff] (!%p139_p2)   ;;  %v471_v6 = vld [vmem:[%s590_s1 + $0x20] ss:$8 sps:$4 sm:$0xff] (!%p139_p2)   ;;  %v472_v7 = vld [vmem:[%s590_s1 + $0x34] ss:$8 sps:$4 sm:$0xff] (!%p139_p2)  }
   0x8   : > { %295 = vmatprep.subr.bf16.mxu0 (!%p139_p2), %v466_v3  ;;  %v474_v8 = vld [vmem:[%s590_s1 + $0x30] ss:$8 sps:$4 sm:$0xff] (!%p139_p2)   ;;  %v475_v9 = vld [vmem:[%s590_s1 + $0x44] ss:$8 sps:$4 sm:$0xff] (!%p139_p2)   ;;  %v477_v10 = vld [vmem:[%s590_s1 + $0x40] ss:$8 sps:$4 sm:$0xff] (!%p139_p2)  }
   0x9   : > { %v478_v11 = vld [vmem:[%s590_s1 + $0x54] ss:$8 sps:$4 sm:$0xff] (!%p139_p2)   ;;  %v480_v12 = vld [vmem:[%s590_s1 + $0x50] ss:$8 sps:$4 sm:$0xff] (!%p139_p2)   ;;  %v481_v13 = vld [vmem:[%s590_s1 + $0x64] ss:$8 sps:$4 sm:$0xff] (!%p139_p2)  }
   0xa   : > { %v483_v14 = vld [vmem:[%s590_s1 + $0x60] ss:$8 sps:$4 sm:$0xff] (!%p139_p2)   ;;  %v484_v15 = vld [vmem:[%s590_s1 + $0x74] ss:$8 sps:$4 sm:$0xff] (!%p139_p2)   ;;  %v486_v16 = vld [vmem:[%s590_s1 + $0x70] ss:$8 sps:$4 sm:$0xff] (!%p139_p2)  }
   0xb   : > { %296 = vmatpush1.bf16.msra.mxu0 (!%p139_p2), %v468_v4  ;;  %v198_v19 = vshrl.u32 (!%p139_p2), %v197_v18, 7  ;;  %v195_v21 = vld [vmem:[%s591_s2] sm:$0x3] (!%p139_p2) }
   0xc   : > { %297 = vmatprep.subr.bf16.mxu0 (!%p139_p2), %v469_v5 }
   0xd   : > { %s594_s16 = smov (!%p164_p3, %s425_s16), 7  ;;  %v199_v20 = vsub.s32 0, %v198_v19  ;;  %v203_v22 = vsub.s32 1, %v198_v19 }
   0xe   : > { %s426_s25 = sshll.u32 %s594_s16, 2  ;;  %s451_s28 = sshll.u32 %s594_s16, 3 }
   0xf   : > { %s167_s5 = scalar_lea.vmem %s589_s0, %s426_s25  ;;  %298 = vmatpush1.bf16.msra.mxu0 %v471_v6  ;;  %v200_v23 = vrot.slane %v195_v21, %v199_v20  ;;  %v204_v24 = vrot.slane %v195_v21, %v203_v22  ;;  %s174_s4 = scalar_lea.vmem %s592_s3, %s451_s28 }
  0x10   : > { %299 = vmatprep.subr.bf16.mxu0 %v472_v7  ;;  %v487_v17 = vld [vmem:[%s167_s5] sm:$0xff]  }
  0x13   : > { %300 = vmatpush1.bf16.msra.mxu0 %v474_v8 }
  0x14   : > { %301 = vmatprep.subr.bf16.mxu0 %v475_v9 }
  0x17   : > { %302 = vmatpush1.bf16.msra.mxu0 %v477_v10 }
  0x18   : > { %303 = vmatprep.subr.bf16.mxu0 %v478_v11 }
  0x1b   : > { %304 = vmatpush1.bf16.msra.mxu0 %v480_v12 }
  0x1c   : > { %305 = vmatprep.subr.bf16.mxu0 %v481_v13 }
  0x1f   : > { %306 = vmatpush1.bf16.msra.mxu0 %v483_v14 }
  0x20   : > { %307 = vmatprep.subr.bf16.mxu0 %v484_v15 }
  0x23   : > { %308 = vmatpush1.bf16.msra.mxu0 %v486_v16 }
  0x26   : > { %326 = vmatmul.mubr.bf16.vlgmr.msra.gmra.mrb[0].mxu0 %v487_v17 }
  0xf9   : > { %v327_v25 = vpop.f32.mrb[0].mxu0 }
  0xfa   : > { %v328_v26 = vadd.f32 %v327_v25, %v200_v23  ;;  %v329_v27 = vpop.f32.mrb[1].mxu0 }
  0xfb   : > { %v330_v28 = vadd.f32 %v329_v27, %v204_v24  ;;  %v331_v29 = vpop.f32.mrb[2].mxu0 }
  0xfc   : > { %vm336_vm0 = vcmp.gt.f32.partialorder %v328_v26, 0.0  ;;  %v340_v30 = vmul.f32 0.2, %v328_v26  ;;  %v332_v31 = vadd.f32 %v331_v29, %v200_v23  ;;  %v333_v32 = vpop.f32.mrb[3].mxu0 }
  0xfd   : > { %vm337_vm1 = vcmp.gt.f32.partialorder %v330_v28, 0.0  ;;  %v341_v33 = vmul.f32 0.2, %v330_v28  ;;  %v334_v34 = vadd.f32 %v333_v32, %v204_v24 }
  0xfe   : > { %v344_v35 = vsel %vm336_vm0, %v328_v26, %v340_v30  ;;  %vm338_vm2 = vcmp.gt.f32.partialorder %v332_v31, 0.0  ;;  %v342_v36 = vmul.f32 0.2, %v332_v31 }
  0xff   : > { %v345_v37 = vsel %vm337_vm1, %v330_v28, %v341_v33  ;;  %vm339_vm3 = vcmp.gt.f32.partialorder %v334_v34, 0.0  ;;  %v343_v38 = vmul.f32 0.2, %v334_v34 }
 0x100   : > { %v452_v39 = vpack.c.bf16 %v345_v37, %v344_v35  ;;  %v346_v40 = vsel %vm338_vm2, %v332_v31, %v342_v36 }
 0x101   : > { %v347_v41 = vsel %vm339_vm3, %v334_v34, %v343_v38 }
 0x102   : > { %360 = vst [vmem:[%s174_s4] sm:$0xff] %v452_v39  ;;  %v453_v42 = vpack.c.bf16 %v347_v41, %v346_v40 }
 0x104   : > { %361 = vst [vmem:[%s174_s4 + $0x8] sm:$0xff] %v453_v42 }
 0x105 PF: > { %s13_s12 = sadd.s32 1, %s494_s12  }
 0x106   : > { %p10_p4 = scmp.ge.s32.totalorder %s13_s12, 6  }
 0x108   :  { %12 = sbr.rel (!%p10_p4) target bundleno = 1 (0x1), region = 62 }

// kernel: tile.10
= control target key start
LH: loop header
LB: loop body
LE: loop exit
PB: predicated region body
PF: predicated region fallthrough
CT: control target
= control target key end

     0   :  { %s22_s0 = inlined_call_operand.vmem [shape: f32[64], index: 0, kind: input, shape index: {}]   ;;  %s23_s1 = inlined_call_operand.vmem [shape: f32[2,64], index: 1, kind: output, shape index: {}]  }
   0x1   :  { %v4_v0 = vld [vmem:[%s22_s0] ss:$0 sm:$0xff] }
   0x2   :  { %5 = vst [vmem:[%s23_s1] sm:$0x3] %v4_v0 }

// kernel: tile.11
= control target key start
LH: loop header
LB: loop body
LE: loop exit
PB: predicated region body
PF: predicated region fallthrough
CT: control target
= control target key end

     0   :  { %vm7_vm0 = vcmask 523264   ;;  %vm13_vm1 = vcmask 1048064   ;;  %s39_s0 = inlined_call_operand.vmem [shape: f32[2,64], index: 0, kind: input, shape index: {}]   ;;  %s40_s1 = inlined_call_operand.vmem [shape: f32[1,128], index: 1, kind: output, shape index: {}]  }
   0x1   :  { %v4_v0 = vld [vmem:[%s39_s0] sm:$0x3]  ;;  %s22_s0 = smov 64  }
   0x2   :  { %5 = vst [vmem:[#allocation1] sm:$0x3] %v4_v0 }
   0x9   :  { %v10_v1 = vld [vmem:[#allocation1 + $0x1] sm:$0x1]   ;;  %v6_v2 = vld [vmem:[#allocation1] sm:$0x1]  }
   0xa   :  { %11 = vrot.lane.b32.xlu0 %v10_v1, %s22_s0  ;;  %8 = vst.msk [vmem:[#allocation0] sm:$0x1] %vm7_vm0, %v6_v2  }
  0x7c   :  { %v12_v3 = vpop.permute.xlu0 %11  }
  0x7d   :  { %14 = vst.msk [vmem:[#allocation0] sm:$0x1] %vm13_vm1, %v12_v3  }
  0x84   :  { %v18_v4 = vld [vmem:[#allocation0] sm:$0x1] }
  0x85   :  { %20 = vst [vmem:[%s40_s1] sm:$0x1] %v18_v4 }

// kernel: discriminator_forward.4
= control target key start
LH: loop header
LB: loop body
LE: loop exit
PB: predicated region body
PF: predicated region fallthrough
CT: control target
= control target key end

     0   :  { %s1264_s12 = smov 0   ;;  %s1492_s0 = inlined_call_operand.vmem [shape: bf16[64,1024], index: 0, kind: input, shape index: {}]   ;;  %s1493_s1 = inlined_call_operand.vmem [shape: bf16[1024,128], index: 1, kind: input, shape index: {}]   ;;  %s1494_s2 = inlined_call_operand.vmem [shape: f32[1,128], index: 2, kind: input, shape index: {}]   ;;  %s1495_s3 = inlined_call_operand.vmem [shape: bf16[64,128], index: 3, kind: output, shape index: {}]  }
   0x1 LB: > { %s981_s13 = sadd.s32 4294967295, %s1242_s12   ;;  %p985_p0 = scmp.ge.s32.totalorder %s1242_s12, 1  ;;  %s1242_s12 = sphi %s1264_s12, %s13_s12  }
   0x2   : > { %p139_p1 = scmp.lt.s32.totalorder %s1242_s12, 5 }
   0x4   : > { %p140_p2 = pnand %p985_p0, %p139_p1 }
   0x5   : > { %v1172_v0 = vld [vmem:[%s1493_s1 + $0x40] sm:$0xff] (!%p140_p2)   ;;  %v1176_v4 = vld [vmem:[%s1493_s1 + $0x48] sm:$0xff] (!%p140_p2)   ;;  %v1180_v8 = vld [vmem:[%s1493_s1 + $0x50] sm:$0xff] (!%p140_p2)   ;;  %s986_s21 = sshll.u32 (!%p140_p2), %s981_s13, 1 }
   0x6   : > { %143 = sbr.rel (%p140_p2) target bundleno = 298 (0x12a), region = 32  ;;  %v1173_v1 = vld [vmem:[%s1493_s1 + $0xc0] sm:$0xff] (!%p140_p2)   ;;  %1076 = vmatprep.subr.bf16.mxu0 (!%p140_p2), %v1172_v0  ;;  %v1177_v5 = vld [vmem:[%s1493_s1 + $0xc8] sm:$0xff] (!%p140_p2)   ;;  %v1181_v9 = vld [vmem:[%s1493_s1 + $0xd0] sm:$0xff] (!%p140_p2)   ;;  %p165_p3 = scmp.lt.s32.totalorder (!%p140_p2), %s986_s21, 7 }
   0x7   : > { %v1174_v2 = vld [vmem:[%s1493_s1] sm:$0xff] (!%p140_p2)   ;;  %1098 = vmatprep.subr.bf16.mxu1 (!%p140_p2), %v1173_v1  ;;  %v1178_v6 = vld [vmem:[%s1493_s1 + $0x8] sm:$0xff] (!%p140_p2)   ;;  %v1182_v10 = vld [vmem:[%s1493_s1 + $0x10] sm:$0xff] (!%p140_p2)  }
   0x8   : > { %v1175_v3 = vld [vmem:[%s1493_s1 + $0x80] sm:$0xff] (!%p140_p2)   ;;  %1077 = vmatpush3.bf16.msra.mxu0 (!%p140_p2), %v1174_v2  ;;  %v1179_v7 = vld [vmem:[%s1493_s1 + $0x88] sm:$0xff] (!%p140_p2)   ;;  %v1183_v11 = vld [vmem:[%s1493_s1 + $0x90] sm:$0xff] (!%p140_p2)  }
   0x9   : > { %1099 = vmatpush3.bf16.msra.mxu1 (!%p140_p2), %v1175_v3  ;;  %1078 = vmatprep.subr.bf16.mxu0 (!%p140_p2), %v1176_v4  ;;  %v1184_v12 = vld [vmem:[%s1493_s1 + $0x58] sm:$0xff] (!%p140_p2)   ;;  %v1188_v16 = vld [vmem:[%s1493_s1 + $0x60] sm:$0xff] (!%p140_p2)   ;;  %v1192_v20 = vld [vmem:[%s1493_s1 + $0x68] sm:$0xff] (!%p140_p2)  }
   0xa   : > { %1100 = vmatprep.subr.bf16.mxu1 (!%p140_p2), %v1177_v5  ;;  %v1185_v13 = vld [vmem:[%s1493_s1 + $0xd8] sm:$0xff] (!%p140_p2)   ;;  %v1189_v17 = vld [vmem:[%s1493_s1 + $0xe0] sm:$0xff] (!%p140_p2)   ;;  %v1193_v21 = vld [vmem:[%s1493_s1 + $0xe8] sm:$0xff] (!%p140_p2)  }
   0xb   : > { %v1186_v14 = vld [vmem:[%s1493_s1 + $0x18] sm:$0xff] (!%p140_p2)   ;;  %v1190_v18 = vld [vmem:[%s1493_s1 + $0x20] sm:$0xff] (!%p140_p2)   ;;  %v1194_v22 = vld [vmem:[%s1493_s1 + $0x28] sm:$0xff] (!%p140_p2)  }
   0xc   : > { %1079 = vmatpush3.bf16.msra.mxu0 (!%p140_p2), %v1178_v6  ;;  %v1187_v15 = vld [vmem:[%s1493_s1 + $0x98] sm:$0xff] (!%p140_p2)   ;;  %v1191_v19 = vld [vmem:[%s1493_s1 + $0xa0] sm:$0xff] (!%p140_p2)   ;;  %v1195_v23 = vld [vmem:[%s1493_s1 + $0xa8] sm:$0xff] (!%p140_p2)  }
   0xd   : > { %1101 = vmatpush3.bf16.msra.mxu1 %v1179_v7  ;;  %1080 = vmatprep.subr.bf16.mxu0 %v1180_v8  ;;  %s1497_s21 = smov (!%p165_p3, %s986_s21), 7  ;;  %v1196_v24 = vld [vmem:[%s1493_s1 + $0x70] sm:$0xff]   ;;  %v1200_v28 = vld [vmem:[%s1493_s1 + $0x78] sm:$0xff]   ;;  %v1204_v40 = vld [vmem:[%s1493_s1 + $0x140] sm:$0xff]  }
   0xe   : > { %1102 = vmatprep.subr.bf16.mxu1 %v1181_v9  ;;  %v1197_v25 = vld [vmem:[%s1493_s1 + $0xf0] sm:$0xff]   ;;  %s1068_s18 = sshll.u32 %s1497_s21, 5  ;;  %v1201_v29 = vld [vmem:[%s1493_s1 + $0xf8] sm:$0xff]   ;;  %v1205_v41 = vld [vmem:[%s1493_s1 + $0x1c0] sm:$0xff]  }
   0xf   : > { %v1198_v26 = vld [vmem:[%s1493_s1 + $0x30] sm:$0xff]   ;;  %s1370_s28 = scalar_lea.vmem %s1492_s0, %s1068_s18  ;;  %v1202_v30 = vld [vmem:[%s1493_s1 + $0x38] sm:$0xff]   ;;  %v1206_v42 = vld [vmem:[%s1493_s1 + $0x100] sm:$0xff]  }
  0x10   : > { %1081 = vmatpush3.bf16.msra.mxu0 %v1182_v10  ;;  %v1199_v27 = vld [vmem:[%s1493_s1 + $0xb0] sm:$0xff]   ;;  %v1203_v31 = vld [vmem:[%s1493_s1 + $0xb8] sm:$0xff]   ;;  %v178_v32 = vld [vmem:[%s1370_s28] sm:$0xff] }
  0x11   : > { %1103 = vmatpush3.bf16.msra.mxu1 %v1183_v11  ;;  %1082 = vmatprep.subr.bf16.mxu0 %v1184_v12  ;;  %v182_v33 = vld [vmem:[%s1370_s28 + $0x20] sm:$0xff]  ;;  %v179_v34 = vld [vmem:[%s1370_s28 + $0x8] sm:$0xff]  ;;  %v1212_v48 = vld [vmem:[%s1493_s1 + $0x150] sm:$0xff]  }
  0x12   : > { %1104 = vmatprep.subr.bf16.mxu1 %v1185_v13  ;;  %v992_v35 = vcombine.low %v178_v32, %v182_v33  ;;  %v993_v36 = vcombine.high %v178_v32, %v182_v33  ;;  %v183_v37 = vld [vmem:[%s1370_s28 + $0x28] sm:$0xff]  ;;  %v1207_v43 = vld [vmem:[%s1493_s1 + $0x180] sm:$0xff]   ;;  %v1213_v49 = vld [vmem:[%s1493_s1 + $0x1d0] sm:$0xff]  }
  0x13   : > { %v994_v38 = vcombine.low %v179_v34, %v183_v37  ;;  %v995_v39 = vcombine.high %v179_v34, %v183_v37  ;;  %v1208_v44 = vld [vmem:[%s1493_s1 + $0x148] sm:$0xff]   ;;  %v1214_v50 = vld [vmem:[%s1493_s1 + $0x110] sm:$0xff]   ;;  %v1216_v52 = vld [vmem:[%s1493_s1 + $0x158] sm:$0xff]  }
  0x14   : > { %1083 = vmatpush3.bf16.msra.mxu0 %v1186_v14  ;;  %777 = vmatprep.mubr.bf16.mxu0 %v993_v36  ;;  %v1209_v45 = vld [vmem:[%s1493_s1 + $0x1c8] sm:$0xff]   ;;  %v1215_v51 = vld [vmem:[%s1493_s1 + $0x190] sm:$0xff]   ;;  %v1217_v53 = vld [vmem:[%s1493_s1 + $0x1d8] sm:$0xff]  }
  0x15   : > { %1105 = vmatpush3.bf16.msra.mxu1 %v1187_v15  ;;  %1084 = vmatprep.subr.bf16.mxu0 %v1188_v16  ;;  %v1210_v46 = vld [vmem:[%s1493_s1 + $0x108] sm:$0xff]   ;;  %v1218_v54 = vld [vmem:[%s1493_s1 + $0x118] sm:$0xff]   ;;  %v1220_v56 = vld [vmem:[%s1493_s1 + $0x160] sm:$0xff]  }
  0x16   : > { %1106 = vmatprep.subr.bf16.mxu1 %v1189_v17  ;;  %818 = vmatprep.mubr.bf16.mxu1 %v995_v39  ;;  %v1211_v47 = vld [vmem:[%s1493_s1 + $0x188] sm:$0xff]   ;;  %v1219_v55 = vld [vmem:[%s1493_s1 + $0x198] sm:$0xff]   ;;  %v1221_v57 = vld [vmem:[%s1493_s1 + $0x1e0] sm:$0xff]  }
  0x17   : > { %v1222_v58 = vld [vmem:[%s1493_s1 + $0x120] sm:$0xff]   ;;  %v1224_v60 = vld [vmem:[%s1493_s1 + $0x168] sm:$0xff]   ;;  %v1228_v0 = vld [vmem:[%s1493_s1 + $0x170] sm:$0xff]  }
  0x18   : > { %1085 = vmatpush3.bf16.msra.mxu0 %v1190_v18  ;;  %v1223_v59 = vld [vmem:[%s1493_s1 + $0x1a0] sm:$0xff]   ;;  %v1225_v61 = vld [vmem:[%s1493_s1 + $0x1e8] sm:$0xff]   ;;  %v1229_v1 = vld [vmem:[%s1493_s1 + $0x1f0] sm:$0xff]  }
  0x19   : > { %1107 = vmatpush3.bf16.msra.mxu1 %v1191_v19  ;;  %1086 = vmatprep.subr.bf16.mxu0 %v1192_v20  ;;  %v1226_v62 = vld [vmem:[%s1493_s1 + $0x128] sm:$0xff]   ;;  %v1230_v2 = vld [vmem:[%s1493_s1 + $0x130] sm:$0xff]   ;;  %v1232_v4 = vld [vmem:[%s1493_s1 + $0x178] sm:$0xff]  }
  0x1a   : > { %1108 = vmatprep.subr.bf16.mxu1 %v1193_v21  ;;  %v1227_v63 = vld [vmem:[%s1493_s1 + $0x1a8] sm:$0xff]   ;;  %v1231_v3 = vld [vmem:[%s1493_s1 + $0x1b0] sm:$0xff]   ;;  %v1233_v5 = vld [vmem:[%s1493_s1 + $0x1f8] sm:$0xff]  }
  0x1b   : > { %v1234_v6 = vld [vmem:[%s1493_s1 + $0x138] sm:$0xff]   ;;  %v180_v8 = vld [vmem:[%s1370_s28 + $0x10] sm:$0xff]  ;;  %v991_v18 = vld [vmem:[%s1494_s2] ss:$0 sm:$0xff] }
  0x1c   : > { %1087 = vmatpush3.bf16.msra.mxu0 %v1194_v22  ;;  %v1235_v7 = vld [vmem:[%s1493_s1 + $0x1b8] sm:$0xff]   ;;  %v184_v9 = vld [vmem:[%s1370_s28 + $0x30] sm:$0xff] }
  0x1d   : > { %1109 = vmatpush3.bf16.msra.mxu1 %v1195_v23  ;;  %1088 = vmatprep.subr.bf16.mxu0 %v1196_v24  ;;  %v996_v10 = vcombine.low %v180_v8, %v184_v9  ;;  %v997_v11 = vcombine.high %v180_v8, %v184_v9  ;;  %v181_v12 = vld [vmem:[%s1370_s28 + $0x18] sm:$0xff] }
  0x1e   : > { %1110 = vmatprep.subr.bf16.mxu1 %v1197_v25  ;;  %v185_v13 = vld [vmem:[%s1370_s28 + $0x38] sm:$0xff]  ;;  %s990_s28 = sshll.u32 %s1497_s21, 2 }
  0x1f   : > { %v998_v14 = vcombine.low %v181_v12, %v185_v13  ;;  %v999_v15 = vcombine.high %v181_v12, %v185_v13  ;;  %s175_s29 = scalar_lea.vmem %s1495_s3, %s990_s28 }
  0x20   : > { %1089 = vmatpush3.bf16.msra.mxu0 %v1198_v26 }
  0x21   : > { %1111 = vmatpush3.bf16.msra.mxu1 %v1199_v27  ;;  %1090 = vmatprep.subr.bf16.mxu0 %v1200_v28 }
  0x22   : > { %1112 = vmatprep.subr.bf16.mxu1 %v1201_v29 }
  0x24   : > { %1091 = vmatpush3.bf16.msra.mxu0 %v1202_v30 }
  0x25   : > { %1113 = vmatpush3.bf16.msra.mxu1 %v1203_v31  ;;  %1120 = vmatprep.subr.bf16.mxu0 %v1204_v40 }
  0x26   : > { %1142 = vmatprep.subr.bf16.mxu1 %v1205_v41 }
  0x27   : > { %778 = vmatmul.mubr.bf16.vlgmr.msra.gmra.mrb[0].mxu0 %v992_v35 }
  0x28   : > { %819 = vmatmul.mubr.bf16.vlgmr.msra.gmra.mrb[0].mxu1 %v994_v38  ;;  %1121 = vmatpush3.bf16.msra.mxu0 %v1206_v42 }
  0x29   : > { %1143 = vmatpush3.bf16.msra.mxu1 %v1207_v43  ;;  %1122 = vmatprep.subr.bf16.mxu0 %v1208_v44 }
  0x2a   : > { %1144 = vmatprep.subr.bf16.mxu1 %v1209_v45  ;;  %859 = vmatprep.mubr.bf16.mxu0 %v997_v11 }
  0x2b   : > { %900 = vmatprep.mubr.bf16.mxu1 %v999_v15 }
  0x2c   : > { %1123 = vmatpush3.bf16.msra.mxu0 %v1210_v46 }
  0x2d   : > { %1145 = vmatpush3.bf16.msra.mxu1 %v1211_v47  ;;  %1124 = vmatprep.subr.bf16.mxu0 %v1212_v48 }
  0x2e   : > { %1146 = vmatprep.subr.bf16.mxu1 %v1213_v49 }
  0x30   : > { %1125 = vmatpush3.bf16.msra.mxu0 %v1214_v50 }
  0x31   : > { %1147 = vmatpush3.bf16.msra.mxu1 %v1215_v51  ;;  %1126 = vmatprep.subr.bf16.mxu0 %v1216_v52 }
  0x32   : > { %1148 = vmatprep.subr.bf16.mxu1 %v1217_v53 }
  0x34   : > { %1127 = vmatpush3.bf16.msra.mxu0 %v1218_v54 }
  0x35   : > { %1149 = vmatpush3.bf16.msra.mxu1 %v1219_v55  ;;  %1128 = vmatprep.subr.bf16.mxu0 %v1220_v56 }
  0x36   : > { %1150 = vmatprep.subr.bf16.mxu1 %v1221_v57 }
  0x38   : > { %1129 = vmatpush3.bf16.msra.mxu0 %v1222_v58 }
  0x39   : > { %1151 = vmatpush3.bf16.msra.mxu1 %v1223_v59  ;;  %1130 = vmatprep.subr.bf16.mxu0 %v1224_v60 }
  0x3a   : > { %1152 = vmatprep.subr.bf16.mxu1 %v1225_v61 }
  0x3c   : > { %1131 = vmatpush3.bf16.msra.mxu0 %v1226_v62 }
  0x3d   : > { %1153 = vmatpush3.bf16.msra.mxu1 %v1227_v63  ;;  %1132 = vmatprep.subr.bf16.mxu0 %v1228_v0 }
  0x3e   : > { %1154 = vmatprep.subr.bf16.mxu1 %v1229_v1 }
  0x40   : > { %1133 = vmatpush3.bf16.msra.mxu0 %v1230_v2 }
  0x41   : > { %1155 = vmatpush3.bf16.msra.mxu1 %v1231_v3  ;;  %1134 = vmatprep.subr.bf16.mxu0 %v1232_v4 }
  0x42   : > { %1156 = vmatprep.subr.bf16.mxu1 %v1233_v5 }
  0x44   : > { %1135 = vmatpush3.bf16.msra.mxu0 %v1234_v6 }
  0x45   : > { %1157 = vmatpush3.bf16.msra.mxu1 %v1235_v7 }
  0x47   : > { %860 = vmatmul.mubr.bf16.vlgmr.msra.gmra.mrb[4].mxu0 %v996_v10 }
  0x48   : > { %901 = vmatmul.mubr.bf16.vlgmr.msra.gmra.mrb[4].mxu1 %v998_v14 }
  0xfa   : > { %v1092_v16 = vpop.f32.mrb[0].mxu0 }
  0xfb   : > { %v1114_v17 = vpop.f32.mrb[0].mxu1  ;;  %v1093_v19 = vpop.f32.mrb[1].mxu0 }
  0xfc   : > { %v1094_v20 = vadd.f32 %v1093_v19, %v1092_v16  ;;  %v1115_v21 = vpop.f32.mrb[1].mxu1  ;;  %v1095_v22 = vpop.f32.mrb[2].mxu0 }
  0xfd   : > { %v1116_v23 = vadd.f32 %v1115_v21, %v1114_v17  ;;  %v1117_v24 = vpop.f32.mrb[2].mxu1  ;;  %v1096_v25 = vpop.f32.mrb[3].mxu0 }
  0xfe   : > { %v780_v26 = vadd.f32 %v1094_v20, %v991_v18  ;;  %v1097_v27 = vadd.f32 %v1096_v25, %v1095_v22  ;;  %v1118_v28 = vpop.f32.mrb[3].mxu1 }
  0xff   : > { %v1119_v29 = vadd.f32 %v1118_v28, %v1117_v24 }
 0x100   : > { %v821_v30 = vadd.f32 %v1116_v23, %v780_v26  ;;  %v783_v31 = vadd.f32 %v1097_v27, %v991_v18 }
 0x102   : > { %v824_v32 = vadd.f32 %v1119_v29, %v783_v31 }
 0x11a   : > { %v1136_v33 = vpop.f32.mrb[4].mxu0 }
 0x11b   : > { %v1158_v34 = vpop.f32.mrb[4].mxu1  ;;  %v1137_v35 = vpop.f32.mrb[5].mxu0 }
 0x11c   : > { %v1138_v36 = vadd.f32 %v1137_v35, %v1136_v33  ;;  %v1159_v37 = vpop.f32.mrb[5].mxu1  ;;  %v1139_v38 = vpop.f32.mrb[6].mxu0 }
 0x11d   : > { %v1160_v39 = vadd.f32 %v1159_v37, %v1158_v34  ;;  %v1161_v40 = vpop.f32.mrb[6].mxu1  ;;  %v1140_v41 = vpop.f32.mrb[7].mxu0 }
 0x11e   : > { %v862_v42 = vadd.f32 %v1138_v36, %v821_v30  ;;  %v1141_v43 = vadd.f32 %v1140_v41, %v1139_v38  ;;  %v1162_v44 = vpop.f32.mrb[7].mxu1 }
 0x11f   : > { %v1163_v45 = vadd.f32 %v1162_v44, %v1161_v40 }
 0x120   : > { %v903_v46 = vadd.f32 %v1160_v39, %v862_v42  ;;  %v865_v47 = vadd.f32 %v1141_v43, %v824_v32 }
 0x122   : > { %v911_v48 = vmul.f32 0.2, %v903_v46  ;;  %v906_v49 = vadd.f32 %v1163_v45, %v865_v47  ;;  %vm909_vm0 = vcmp.gt.f32.partialorder %v903_v46, 0.0 }
 0x124   : > { %vm910_vm1 = vcmp.gt.f32.partialorder %v906_v49, 0.0  ;;  %v912_v50 = vmul.f32 0.2, %v906_v49  ;;  %v913_v51 = vsel %vm909_vm0, %v903_v46, %v911_v48 }
 0x126   : > { %v914_v52 = vsel %vm910_vm1, %v906_v49, %v912_v50 }
 0x127   : > { %v1074_v53 = vpack.c.bf16 %v914_v52, %v913_v51 }
 0x129   : > { %1075 = vst [vmem:[%s175_s29] sm:$0xff] %v1074_v53  }
 0x12a PF: > { %s13_s12 = sadd.s32 1, %s1242_s12  }
 0x12b   : > { %p10_p4 = scmp.ge.s32.totalorder %s13_s12, 6  }
 0x12d   :  { %12 = sbr.rel (!%p10_p4) target bundleno = 1 (0x1), region = 62 }

// kernel: discriminator_forward.5
= control target key start
LH: loop header
LB: loop body
LE: loop exit
PB: predicated region body
PF: predicated region fallthrough
CT: control target
= control target key end

     0   :  { %s1294_s15 = smov 0   ;;  %s1525_s0 = inlined_call_operand.vmem [shape: bf16[32,1024], index: 0, kind: input, shape index: {}]   ;;  %s1526_s1 = inlined_call_operand.vmem [shape: bf16[1024,128], index: 1, kind: input, shape index: {}]   ;;  %s1527_s2 = inlined_call_operand.vmem [shape: f32[1,128], index: 2, kind: input, shape index: {}]   ;;  %s1528_s3 = inlined_call_operand.vmem [shape: bf16[16,128], index: 3, kind: input, shape index: {}]   ;;  %s1529_s4 = inlined_call_operand.vmem [shape: f32[32,1], index: 4, kind: output, shape index: {}]  }
   0x1 LB: > { %s1011_s16 = sadd.s32 4294967295, %s1267_s15   ;;  %p1015_p0 = scmp.ge.s32.totalorder %s1267_s15, 1  ;;  %s1267_s15 = sphi %s1294_s15, %s14_s15  }
   0x2   : > { %p164_p1 = scmp.lt.s32.totalorder %s1267_s15, 3 }
   0x4   : > { %p165_p2 = pnand %p1015_p0, %p164_p1 }
   0x5   : > { %v1197_v0 = vld [vmem:[%s1526_s1 + $0x40] sm:$0xff] (!%p165_p2)   ;;  %v1201_v4 = vld [vmem:[%s1526_s1 + $0x48] sm:$0xff] (!%p165_p2)   ;;  %v1205_v8 = vld [vmem:[%s1526_s1 + $0x50] sm:$0xff] (!%p165_p2)   ;;  %s1016_s25 = sshll.u32 (!%p165_p2), %s1011_s16, 1  ;;  %vm952_vm2 = vcmask (!%p165_p2), 7168  }
   0x6   : > { %168 = sbr.rel (%p165_p2) target bundleno = 442 (0x1ba), region = 36  ;;  %v1198_v1 = vld [vmem:[%s1526_s1 + $0xc0] sm:$0xff] (!%p165_p2)   ;;  %1101 = vmatprep.subr.bf16.mxu0 (!%p165_p2), %v1197_v0  ;;  %v1202_v5 = vld [vmem:[%s1526_s1 + $0xc8] sm:$0xff] (!%p165_p2)   ;;  %v1206_v9 = vld [vmem:[%s1526_s1 + $0xd0] sm:$0xff] (!%p165_p2)   ;;  %p192_p3 = scmp.lt.s32.totalorder (!%p165_p2), %s1016_s25, 3 }
   0x7   : > { %v1199_v2 = vld [vmem:[%s1526_s1] sm:$0xff] (!%p165_p2)   ;;  %1123 = vmatprep.subr.bf16.mxu1 (!%p165_p2), %v1198_v1  ;;  %v1203_v6 = vld [vmem:[%s1526_s1 + $0x8] sm:$0xff] (!%p165_p2)   ;;  %v1207_v10 = vld [vmem:[%s1526_s1 + $0x10] sm:$0xff] (!%p165_p2)  }
   0x8   : > { %v1200_v3 = vld [vmem:[%s1526_s1 + $0x80] sm:$0xff] (!%p165_p2)   ;;  %1102 = vmatpush3.bf16.msra.mxu0 (!%p165_p2), %v1199_v2  ;;  %v1204_v7 = vld [vmem:[%s1526_s1 + $0x88] sm:$0xff] (!%p165_p2)   ;;  %v1208_v11 = vld [vmem:[%s1526_s1 + $0x90] sm:$0xff] (!%p165_p2)  }
   0x9   : > { %1124 = vmatpush3.bf16.msra.mxu1 (!%p165_p2), %v1200_v3  ;;  %1103 = vmatprep.subr.bf16.mxu0 (!%p165_p2), %v1201_v4  ;;  %v1209_v12 = vld [vmem:[%s1526_s1 + $0x58] sm:$0xff] (!%p165_p2)   ;;  %v1213_v16 = vld [vmem:[%s1526_s1 + $0x60] sm:$0xff] (!%p165_p2)   ;;  %v1217_v20 = vld [vmem:[%s1526_s1 + $0x68] sm:$0xff] (!%p165_p2)  }
   0xa   : > { %1125 = vmatprep.subr.bf16.mxu1 (!%p165_p2), %v1202_v5  ;;  %v1210_v13 = vld [vmem:[%s1526_s1 + $0xd8] sm:$0xff] (!%p165_p2)   ;;  %v1214_v17 = vld [vmem:[%s1526_s1 + $0xe0] sm:$0xff] (!%p165_p2)   ;;  %v1218_v21 = vld [vmem:[%s1526_s1 + $0xe8] sm:$0xff] (!%p165_p2)  }
   0xb   : > { %v1211_v14 = vld [vmem:[%s1526_s1 + $0x18] sm:$0xff] (!%p165_p2)   ;;  %v1215_v18 = vld [vmem:[%s1526_s1 + $0x20] sm:$0xff] (!%p165_p2)   ;;  %v1219_v22 = vld [vmem:[%s1526_s1 + $0x28] sm:$0xff] (!%p165_p2)  }
   0xc   : > { %1104 = vmatpush3.bf16.msra.mxu0 (!%p165_p2), %v1203_v6  ;;  %v1212_v15 = vld [vmem:[%s1526_s1 + $0x98] sm:$0xff] (!%p165_p2)   ;;  %v1216_v19 = vld [vmem:[%s1526_s1 + $0xa0] sm:$0xff] (!%p165_p2)   ;;  %v1220_v23 = vld [vmem:[%s1526_s1 + $0xa8] sm:$0xff] (!%p165_p2)  }
   0xd   : > { %1126 = vmatpush3.bf16.msra.mxu1 %v1204_v7  ;;  %1105 = vmatprep.subr.bf16.mxu0 %v1205_v8  ;;  %s1531_s25 = smov (!%p192_p3, %s1016_s25), 3  ;;  %v1221_v24 = vld [vmem:[%s1526_s1 + $0x70] sm:$0xff]   ;;  %v1225_v28 = vld [vmem:[%s1526_s1 + $0x78] sm:$0xff]   ;;  %v1229_v40 = vld [vmem:[%s1526_s1 + $0x140] sm:$0xff]  }
   0xe   : > { %1127 = vmatprep.subr.bf16.mxu1 %v1206_v9  ;;  %v1222_v25 = vld [vmem:[%s1526_s1 + $0xf0] sm:$0xff]   ;;  %s1096_s23 = sshll.u32 %s1531_s25, 5  ;;  %v1226_v29 = vld [vmem:[%s1526_s1 + $0xf8] sm:$0xff]   ;;  %v1230_v41 = vld [vmem:[%s1526_s1 + $0x1c0] sm:$0xff]   ;;  %s1020_s9 = sshll.u32 %s1531_s25, 3 }
   0xf   : > { %v1223_v26 = vld [vmem:[%s1526_s1 + $0x30] sm:$0xff]   ;;  %s1400_s7 = scalar_lea.vmem %s1525_s0, %s1096_s23  ;;  %v1227_v30 = vld [vmem:[%s1526_s1 + $0x38] sm:$0xff]   ;;  %v1231_v42 = vld [vmem:[%s1526_s1 + $0x100] sm:$0xff]   ;;  %s202_s12 = scalar_lea.vmem %s1529_s4, %s1020_s9 }
  0x10   : > { %1106 = vmatpush3.bf16.msra.mxu0 %v1207_v10  ;;  %v1224_v27 = vld [vmem:[%s1526_s1 + $0xb0] sm:$0xff]   ;;  %v1228_v31 = vld [vmem:[%s1526_s1 + $0xb8] sm:$0xff]   ;;  %v205_v32 = vld [vmem:[%s1400_s7] sm:$0xff] }
  0x11   : > { %1128 = vmatpush3.bf16.msra.mxu1 %v1208_v11  ;;  %1107 = vmatprep.subr.bf16.mxu0 %v1209_v12  ;;  %v209_v33 = vld [vmem:[%s1400_s7 + $0x20] sm:$0xff]  ;;  %v206_v34 = vld [vmem:[%s1400_s7 + $0x8] sm:$0xff]  ;;  %v1237_v48 = vld [vmem:[%s1526_s1 + $0x150] sm:$0xff]  }
  0x12   : > { %1129 = vmatprep.subr.bf16.mxu1 %v1210_v13  ;;  %v1022_v35 = vcombine.low %v205_v32, %v209_v33  ;;  %v1023_v36 = vcombine.high %v205_v32, %v209_v33  ;;  %v210_v37 = vld [vmem:[%s1400_s7 + $0x28] sm:$0xff]  ;;  %v1232_v43 = vld [vmem:[%s1526_s1 + $0x180] sm:$0xff]   ;;  %v1238_v49 = vld [vmem:[%s1526_s1 + $0x1d0] sm:$0xff]  }
  0x13   : > { %v1024_v38 = vcombine.low %v206_v34, %v210_v37  ;;  %v1025_v39 = vcombine.high %v206_v34, %v210_v37  ;;  %v1233_v44 = vld [vmem:[%s1526_s1 + $0x148] sm:$0xff]   ;;  %v1239_v50 = vld [vmem:[%s1526_s1 + $0x110] sm:$0xff]   ;;  %v1241_v52 = vld [vmem:[%s1526_s1 + $0x158] sm:$0xff]  }
  0x14   : > { %1108 = vmatpush3.bf16.msra.mxu0 %v1211_v14  ;;  %804 = vmatprep.mubr.bf16.mxu0 %v1023_v36  ;;  %v1234_v45 = vld [vmem:[%s1526_s1 + $0x1c8] sm:$0xff]   ;;  %v1240_v51 = vld [vmem:[%s1526_s1 + $0x190] sm:$0xff]   ;;  %v1242_v53 = vld [vmem:[%s1526_s1 + $0x1d8] sm:$0xff]  }
  0x15   : > { %1130 = vmatpush3.bf16.msra.mxu1 %v1212_v15  ;;  %1109 = vmatprep.subr.bf16.mxu0 %v1213_v16  ;;  %v1235_v46 = vld [vmem:[%s1526_s1 + $0x108] sm:$0xff]   ;;  %v1243_v54 = vld [vmem:[%s1526_s1 + $0x118] sm:$0xff]   ;;  %v1245_v56 = vld [vmem:[%s1526_s1 + $0x160] sm:$0xff]  }
  0x16   : > { %1131 = vmatprep.subr.bf16.mxu1 %v1214_v17  ;;  %845 = vmatprep.mubr.bf16.mxu1 %v1025_v39  ;;  %v1236_v47 = vld [vmem:[%s1526_s1 + $0x188] sm:$0xff]   ;;  %v1244_v55 = vld [vmem:[%s1526_s1 + $0x198] sm:$0xff]   ;;  %v1246_v57 = vld [vmem:[%s1526_s1 + $0x1e0] sm:$0xff]  }
  0x17   : > { %v1247_v58 = vld [vmem:[%s1526_s1 + $0x120] sm:$0xff]   ;;  %v1249_v60 = vld [vmem:[%s1526_s1 + $0x168] sm:$0xff]   ;;  %v1253_v0 = vld [vmem:[%s1526_s1 + $0x170] sm:$0xff]  }
  0x18   : > { %1110 = vmatpush3.bf16.msra.mxu0 %v1215_v18  ;;  %v1248_v59 = vld [vmem:[%s1526_s1 + $0x1a0] sm:$0xff]   ;;  %v1250_v61 = vld [vmem:[%s1526_s1 + $0x1e8] sm:$0xff]   ;;  %v1254_v1 = vld [vmem:[%s1526_s1 + $0x1f0] sm:$0xff]  }
  0x19   : > { %1132 = vmatpush3.bf16.msra.mxu1 %v1216_v19  ;;  %1111 = vmatprep.subr.bf16.mxu0 %v1217_v20  ;;  %v1251_v62 = vld [vmem:[%s1526_s1 + $0x128] sm:$0xff]   ;;  %v1255_v2 = vld [vmem:[%s1526_s1 + $0x130] sm:$0xff]   ;;  %v1257_v4 = vld [vmem:[%s1526_s1 + $0x178] sm:$0xff]  }
  0x1a   : > { %1133 = vmatprep.subr.bf16.mxu1 %v1218_v21  ;;  %v1252_v63 = vld [vmem:[%s1526_s1 + $0x1a8] sm:$0xff]   ;;  %v1256_v3 = vld [vmem:[%s1526_s1 + $0x1b0] sm:$0xff]   ;;  %v1258_v5 = vld [vmem:[%s1526_s1 + $0x1f8] sm:$0xff]  }
  0x1b   : > { %v1259_v6 = vld [vmem:[%s1526_s1 + $0x138] sm:$0xff]   ;;  %v207_v8 = vld [vmem:[%s1400_s7 + $0x10] sm:$0xff]  ;;  %v1021_v18 = vld [vmem:[%s1527_s2] ss:$0 sm:$0xff] }
  0x1c   : > { %1112 = vmatpush3.bf16.msra.mxu0 %v1219_v22  ;;  %v1260_v7 = vld [vmem:[%s1526_s1 + $0x1b8] sm:$0xff]   ;;  %v211_v9 = vld [vmem:[%s1400_s7 + $0x30] sm:$0xff] }
  0x1d   : > { %1134 = vmatpush3.bf16.msra.mxu1 %v1220_v23  ;;  %1113 = vmatprep.subr.bf16.mxu0 %v1221_v24  ;;  %v1026_v10 = vcombine.low %v207_v8, %v211_v9  ;;  %v1027_v11 = vcombine.high %v207_v8, %v211_v9  ;;  %v208_v12 = vld [vmem:[%s1400_s7 + $0x18] sm:$0xff] }
  0x1e   : > { %1135 = vmatprep.subr.bf16.mxu1 %v1222_v25  ;;  %v212_v13 = vld [vmem:[%s1400_s7 + $0x38] sm:$0xff] }
  0x1f   : > { %v1028_v14 = vcombine.low %v208_v12, %v212_v13  ;;  %v1029_v15 = vcombine.high %v208_v12, %v212_v13 }
  0x20   : > { %1114 = vmatpush3.bf16.msra.mxu0 %v1223_v26 }
  0x21   : > { %1136 = vmatpush3.bf16.msra.mxu1 %v1224_v27  ;;  %1115 = vmatprep.subr.bf16.mxu0 %v1225_v28 }
  0x22   : > { %1137 = vmatprep.subr.bf16.mxu1 %v1226_v29 }
  0x24   : > { %1116 = vmatpush3.bf16.msra.mxu0 %v1227_v30 }
  0x25   : > { %1138 = vmatpush3.bf16.msra.mxu1 %v1228_v31  ;;  %1145 = vmatprep.subr.bf16.mxu0 %v1229_v40 }
  0x26   : > { %1167 = vmatprep.subr.bf16.mxu1 %v1230_v41 }
  0x27   : > { %805 = vmatmul.mubr.bf16.vlgmr.msra.gmra.mrb[0].mxu0 %v1022_v35 }
  0x28   : > { %846 = vmatmul.mubr.bf16.vlgmr.msra.gmra.mrb[0].mxu1 %v1024_v38  ;;  %1146 = vmatpush3.bf16.msra.mxu0 %v1231_v42 }
  0x29   : > { %1168 = vmatpush3.bf16.msra.mxu1 %v1232_v43  ;;  %1147 = vmatprep.subr.bf16.mxu0 %v1233_v44 }
  0x2a   : > { %1169 = vmatprep.subr.bf16.mxu1 %v1234_v45  ;;  %886 = vmatprep.mubr.bf16.mxu0 %v1027_v11  ;;  %v1098_v45 = vld [vmem:[%s1528_s3] sm:$0xff]  }
  0x2b   : > { %927 = vmatprep.mubr.bf16.mxu1 %v1029_v15 }
  0x2c   : > { %1148 = vmatpush3.bf16.msra.mxu0 %v1235_v46 }
  0x2d   : > { %1170 = vmatpush3.bf16.msra.mxu1 %v1236_v47  ;;  %1149 = vmatprep.subr.bf16.mxu0 %v1237_v48 }
  0x2e   : > { %1171 = vmatprep.subr.bf16.mxu1 %v1238_v49  ;;  %v1099_v49 = vunpack.c.l.bf16 %v1098_v45 }
  0x30   : > { %1150 = vmatpush3.bf16.msra.mxu0 %v1239_v50 }
  0x31   : > { %1172 = vmatpush3.bf16.msra.mxu1 %v1240_v51  ;;  %1151 = vmatprep.subr.bf16.mxu0 %v1241_v52 }
  0x32   : > { %1173 = vmatprep.subr.bf16.mxu1 %v1242_v53 }
  0x34   : > { %1152 = vmatpush3.bf16.msra.mxu0 %v1243_v54 }
  0x35   : > { %1174 = vmatpush3.bf16.msra.mxu1 %v1244_v55  ;;  %1153 = vmatprep.subr.bf16.mxu0 %v1245_v56  ;;  %v1100_v55 = vunpack.c.h.bf16 %v1098_v45 }
  0x36   : > { %1175 = vmatprep.subr.bf16.mxu1 %v1246_v57 }
  0x38   : > { %1154 = vmatpush3.bf16.msra.mxu0 %v1247_v58 }
  0x39   : > { %1176 = vmatpush3.bf16.msra.mxu1 %v1248_v59  ;;  %1155 = vmatprep.subr.bf16.mxu0 %v1249_v60 }
  0x3a   : > { %1177 = vmatprep.subr.bf16.mxu1 %v1250_v61 }
  0x3c   : > { %1156 = vmatpush3.bf16.msra.mxu0 %v1251_v62 }
  0x3d   : > { %1178 = vmatpush3.bf16.msra.mxu1 %v1252_v63  ;;  %1157 = vmatprep.subr.bf16.mxu0 %v1253_v0 }
  0x3e   : > { %1179 = vmatprep.subr.bf16.mxu1 %v1254_v1 }
  0x40   : > { %1158 = vmatpush3.bf16.msra.mxu0 %v1255_v2 }
  0x41   : > { %1180 = vmatpush3.bf16.msra.mxu1 %v1256_v3  ;;  %1159 = vmatprep.subr.bf16.mxu0 %v1257_v4 }
  0x42   : > { %1181 = vmatprep.subr.bf16.mxu1 %v1258_v5 }
  0x44   : > { %1160 = vmatpush3.bf16.msra.mxu0 %v1259_v6 }
  0x45   : > { %1182 = vmatpush3.bf16.msra.mxu1 %v1260_v7 }
  0x47   : > { %887 = vmatmul.mubr.bf16.vlgmr.msra.gmra.mrb[4].mxu0 %v1026_v10 }
  0x48   : > { %928 = vmatmul.mubr.bf16.vlgmr.msra.gmra.mrb[4].mxu1 %v1028_v14 }
  0xfa   : > { %v1117_v16 = vpop.f32.mrb[0].mxu0 }
  0xfb   : > { %v1139_v17 = vpop.f32.mrb[0].mxu1  ;;  %v1118_v19 = vpop.f32.mrb[1].mxu0 }
  0xfc   : > { %v1119_v20 = vadd.f32 %v1118_v19, %v1117_v16  ;;  %v1140_v21 = vpop.f32.mrb[1].mxu1  ;;  %v1120_v22 = vpop.f32.mrb[2].mxu0 }
  0xfd   : > { %v1141_v23 = vadd.f32 %v1140_v21, %v1139_v17  ;;  %v1142_v24 = vpop.f32.mrb[2].mxu1  ;;  %v1121_v25 = vpop.f32.mrb[3].mxu0 }
  0xfe   : > { %v807_v26 = vadd.f32 %v1119_v20, %v1021_v18  ;;  %v1122_v27 = vadd.f32 %v1121_v25, %v1120_v22  ;;  %v1143_v28 = vpop.f32.mrb[3].mxu1 }
  0xff   : > { %v1144_v29 = vadd.f32 %v1143_v28, %v1142_v24 }
 0x100   : > { %v848_v30 = vadd.f32 %v1141_v23, %v807_v26  ;;  %v810_v31 = vadd.f32 %v1122_v27, %v1021_v18 }
 0x102   : > { %v851_v32 = vadd.f32 %v1144_v29, %v810_v31 }
 0x11a   : > { %v1161_v33 = vpop.f32.mrb[4].mxu0 }
 0x11b   : > { %v1183_v34 = vpop.f32.mrb[4].mxu1  ;;  %v1162_v35 = vpop.f32.mrb[5].mxu0 }
 0x11c   : > { %v1163_v36 = vadd.f32 %v1162_v35, %v1161_v33  ;;  %v1184_v37 = vpop.f32.mrb[5].mxu1  ;;  %v1164_v38 = vpop.f32.mrb[6].mxu0 }
 0x11d   : > { %v1185_v39 = vadd.f32 %v1184_v37, %v1183_v34  ;;  %v1186_v40 = vpop.f32.mrb[6].mxu1  ;;  %v1165_v41 = vpop.f32.mrb[7].mxu0 }
 0x11e   : > { %v889_v42 = vadd.f32 %v1163_v36, %v848_v30  ;;  %v1166_v43 = vadd.f32 %v1165_v41, %v1164_v38  ;;  %v1187_v44 = vpop.f32.mrb[7].mxu1 }
 0x11f   : > { %v1188_v46 = vadd.f32 %v1187_v44, %v1186_v40 }
 0x120   : > { %v930_v47 = vadd.f32 %v1185_v39, %v889_v42  ;;  %v892_v48 = vadd.f32 %v1166_v43, %v851_v32 }
 0x122   : > { %v933_v50 = vadd.f32 %v1188_v46, %v892_v48  ;;  %vm936_vm0 = vcmp.gt.f32.partialorder %v930_v47, 0.0  ;;  %v938_v51 = vmul.f32 0.2, %v930_v47 }
 0x124   : > { %v940_v52 = vsel %vm936_vm0, %v930_v47, %v938_v51  ;;  %vm937_vm1 = vcmp.gt.f32.partialorder %v933_v50, 0.0  ;;  %v939_v53 = vmul.f32 0.2, %v933_v50 }
 0x125   : > { %v946_v54 = vmul.f32 %v1099_v49, %v940_v52 }
 0x126   : > { %v941_v56 = vsel %vm937_vm1, %v933_v50, %v939_v53 }
 0x127   : > { %948 = vadd.xlane.f32.xlu0 %v946_v54  ;;  %v947_v57 = vmul.f32 %v1100_v55, %v941_v56 }
 0x12b   : > { %950 = vadd.xlane.f32.xlu0 %v947_v57 }
 0x1b4   : > { %v949_v58 = vpop.xlane.xlu0 %948 }
 0x1b5   : > { %953 = vst.msk [vmem:[%s202_s12] sm:$0xff] %vm952_vm2, %v949_v58 }
 0x1b8   : > { %v951_v59 = vpop.xlane.xlu0 %950 }
 0x1b9   : > { %954 = vst.msk [vmem:[%s202_s12 + $0x8] sm:$0xff] %vm952_vm2, %v951_v59 }
 0x1ba PF: > { %s14_s15 = sadd.s32 1, %s1267_s15  }
 0x1bb   : > { %p11_p4 = scmp.ge.s32.totalorder %s14_s15, 4  }
 0x1bd   :  { %13 = sbr.rel (!%p11_p4) target bundleno = 1 (0x1), region = 66 }

</bundles_post_ra>
